<compile_context>
chip_gen: v7x
topology: tpu7x:2x2x1
jax: 0.10.0
libtpu: 0.0.40
codegen_flags: <defaults>
</compile_context>

<pallas_src>
import numpy as np
import jax
import jax.numpy as jnp
from jax.experimental import pallas as pl
from jax.experimental.pallas import tpu as pltpu


def _deblur_kernel(y_ref, fcr_ref, fci_ref, fhr_ref, fhi_ref,
                   bwr_ref, bwi_ref, bws_ref, oir_ref, oii_ref, o_ref):
    f32 = jnp.float32

    # (H//S, TB*W): only the rows kept by split j, TB images stacked on lanes.
    ysel = y_ref[...]
    fcr = fcr_ref[...]          # (H, H//S) split-compact forward row-DFT (real)
    fci = fci_ref[...]          # (H, H//S) (imag)

    # Forward row DFT: only the kept rows contribute (S x fewer MACs).
    ar = jnp.dot(fcr, ysel, preferred_element_type=f32)     # (H, TB*W)
    ai = jnp.dot(fci, ysel, preferred_element_type=f32)

    # Forward column DFT via block-diagonal F_W (kron(I_TB, F_W)): lane-dense,
    # no reshapes. 3-mult complex product: (ar+i ai)(Bwr+i Bwi).
    bwr = bwr_ref[...]          # (TB*W, TB*W) = kron(I_TB, Re F_W)
    bwi = bwi_ref[...]          # (TB*W, TB*W) = kron(I_TB, Im F_W)
    bws = bws_ref[...]          # bwr + bwi (host-precomputed)
    t1 = jnp.dot(ar, bwr, preferred_element_type=f32)
    t2 = jnp.dot(ai, bwi, preferred_element_type=f32)
    t3 = jnp.dot(ar + ai, bws, preferred_element_type=f32)
    yhr = t1 - t2
    yhi = t3 - t1 - t2

    # Multiply by precomputed conj(OTF)/(|OTF|^2 * H * W), tiled along lanes.
    ir = oir_ref[...]           # (H, TB*W)
    ii = oii_ref[...]
    xhr = yhr * ir - yhi * ii
    xhi = yhr * ii + yhi * ir

    # Inverse row DFT with conj(F_H): reuse forward matrices, flip sign of imag.
    fhr = fhr_ref[...]          # (H, H)
    fhi = fhi_ref[...]
    br = (jnp.dot(fhr, xhr, preferred_element_type=f32) +
          jnp.dot(fhi, xhi, preferred_element_type=f32))
    bi = (jnp.dot(fhr, xhi, preferred_element_type=f32) -
          jnp.dot(fhi, xhr, preferred_element_type=f32))

    # Inverse column DFT with conj(block-diag F_W); only the real part is needed,
    # so 2 matmuls is already minimal.
    x = (jnp.dot(br, bwr, preferred_element_type=f32) +
         jnp.dot(bi, bwi, preferred_element_type=f32))       # (H, TB*W)

    o_ref[...] = x.astype(o_ref.dtype)


def image_slices_deblur(y, physics_filter, num_splits, lane_target=256):
    """y: (B, C, H, W) float32; physics_filter: (1, 1, kh, kw).

    Returns a list of num_splits arrays of shape (B, C, H, W).
    """
    B, C, H, W = y.shape
    S = int(num_splits)
    # TODO(synk): support H % num_splits != 0 (ragged row splits) via masked DFT columns.
    assert H % S == 0, "H must be divisible by num_splits in this implementation"
    BC = B * C

    # Batch TB images per grid step so the lane axis is >= ~lane_target wide.
    TB = max(1, min(lane_target // max(W, 1), BC))
    nbt = -(-BC // TB)
    BCp = nbt * TB
    L = TB * W

    # ---------------- host-side constants (OTF reciprocal in float64) ------------
    k2 = np.asarray(physics_filter, np.float64)[0, 0]           # .squeeze(0).squeeze(0)
    kh, kw = k2.shape
    psf = np.zeros((H, W), np.float64)
    psf[:kh, :kw] = k2
    psf = np.roll(psf, (-(kh // 2), -(kw // 2)), axis=(0, 1))
    otf = np.fft.fft2(psf)
    # conj(OTF)/|OTF|^2 implements the division; 1/(H*W) of the inverse DFT is folded in.
    inv = np.conj(otf) / ((otf.real ** 2 + otf.imag ** 2) * (H * W))
    inv_t = np.tile(inv, (1, TB))                                # (H, TB*W)

    m = np.arange(H)
    fh = np.exp(-2j * np.pi * np.outer(m, m) / H)                # forward row DFT (H, H)
    fc = np.stack([fh[:, j::S] for j in range(S)], axis=0)       # (S, H, H//S) split-compact
    n = np.arange(W)
    fw = np.exp(-2j * np.pi * np.outer(n, n) / W)                # forward col DFT (W, W)
    bdw = np.kron(np.eye(TB), fw)                                # block-diag (TB*W, TB*W)

    f32 = np.float32
    fcr, fci = jnp.asarray(fc.real, f32), jnp.asarray(fc.imag, f32)
    fhr, fhi = jnp.asarray(fh.real, f32), jnp.asarray(fh.imag, f32)
    bwr, bwi = jnp.asarray(bdw.real, f32), jnp.asarray(bdw.imag, f32)
    bws = jnp.asarray(bdw.real + bdw.imag, f32)                  # Karatsuba helper
    oir, oii = jnp.asarray(inv_t.real, f32), jnp.asarray(inv_t.imag, f32)

    # ------------- layout plumbing (XLA side, outside the kernel) ----------------
    # Stack TB images along lanes and regroup rows by split:
    #   ys[bt, j, q, t*W + w] = y_image(bt*TB+t)[q*S + j, w]
    yf = y.reshape(BC, H, W)
    if BCp != BC:
        yf = jnp.pad(yf, ((0, BCp - BC), (0, 0), (0, 0)))
    ys = yf.reshape(nbt, TB, H // S, S, W)
    ys = ys.transpose(0, 3, 2, 1, 4).reshape(nbt, S, H // S, L)

    def const2d(shape):
        return pl.BlockSpec(shape, lambda bt, j: (0, 0))

    # Rough per-step VMEM estimate (double-buffered blocks + f32 temporaries);
    # raise the scoped limit only when the default (16 MiB on v5e) is too small.
    blk_elems = ((H // S) * L + 2 * H * (H // S) + 2 * H * H + 3 * L * L
                 + 2 * H * L + H * L)
    blk_bytes = 4 * (2 * blk_elems + 14 * H * L)
    vmem_limit = None if blk_bytes <= 16 * 2 ** 20 else int(min(blk_bytes * 5 // 4,
                                                                100 * 2 ** 20))

    out = pl.pallas_call(
        _deblur_kernel,
        out_shape=jax.ShapeDtypeStruct((S, nbt, H, L), y.dtype),
        grid_spec=pltpu.PrefetchScalarGridSpec(
            num_scalar_prefetch=0,
            grid=(nbt, S),                       # batch-tile outer, split inner
            in_specs=[
                pl.BlockSpec((pl.Squeezed(), pl.Squeezed(), H // S, L),
                             lambda bt, j: (bt, j, 0, 0)),          # y rows of split j
                pl.BlockSpec((pl.Squeezed(), H, H // S),
                             lambda bt, j: (j, 0, 0)),              # Fc_j (real)
                pl.BlockSpec((pl.Squeezed(), H, H // S),
                             lambda bt, j: (j, 0, 0)),              # Fc_j (imag)
                const2d((H, H)), const2d((H, H)),                   # F_H real/imag
                const2d((L, L)), const2d((L, L)), const2d((L, L)),  # block-diag F_W r/i/r+i
                const2d((H, L)), const2d((H, L)),                   # OTF reciprocal
            ],
            out_specs=pl.BlockSpec((pl.Squeezed(), pl.Squeezed(), H, L),
                                   lambda bt, j: (j, bt, 0, 0)),
        ),
        compiler_params=pltpu.CompilerParams(
            dimension_semantics=("parallel", "parallel"),
            vmem_limit_bytes=vmem_limit),
    )(ys, fcr, fci, fhr, fhi, bwr, bwi, bws, oir, oii)

    # Undo the lane stacking: (S, nbt, H, TB, W) -> (S, BC, H, W)
    out = out.reshape(S, nbt, H, TB, W).transpose(0, 1, 3, 2, 4).reshape(S, BCp, H, W)
    out = out[:, :BC].reshape(S, B, C, H, W)
    return [out[j] for j in range(S)]


def _reference(y, physics_filter, num_splits):
    """Pure numpy reference mirroring the PyTorch module (rfft2 path)."""
    yn = np.asarray(y, np.float64)
    B, C, H, W = yn.shape
    k = np.asarray(physics_filter, np.float64)[0, 0]
    kh, kw = k.shape
    psf = np.zeros((H, W), np.float64)
    psf[:kh, :kw] = k
    psf = np.roll(psf, (-(kh // 2), -(kw // 2)), axis=(0, 1))
    otf = np.fft.rfft2(psf)
    outs = []
    for j in range(num_splits):
        ms = np.zeros_like(yn)
        ms[:, :, j::num_splits, :] = yn[:, :, j::num_splits, :]
        xh = np.fft.rfft2(ms, axes=(-2, -1)) / otf
        outs.append(np.fft.irfft2(xh, s=(H, W), axes=(-2, -1)))
    return outs


if __name__ == "__main__":
    B, C, H, W = 2, 4, 16, 16
    num_splits = 2

    key = jax.random.PRNGKey(0)
    y = jax.random.normal(key, (B, C, H, W), dtype=jnp.float32)
    physics_filter = np.array(
        [[[[0.05, 0.10, 0.05],
           [0.10, 0.40, 0.10],
           [0.05, 0.10, 0.05]]]], dtype=np.float32)   # (1, 1, 3, 3), sums to 1

    slices = image_slices_deblur(y, physics_filter, num_splits)
    slices = [jax.block_until_ready(s) for s in slices]

    ref = _reference(y, physics_filter, num_splits)
    for got, want in zip(slices, ref):
        np.testing.assert_allclose(np.asarray(got), want, rtol=2e-3, atol=2e-3)

    print("KERNEL_OK")
</pallas_src>

<mosaic_0001>
module attributes {stable_mosaic.version = 11 : i64} {
  func.func @_deblur_kernel(%arg0: i32, %arg1: i32, %arg2: memref<1x1x8x128xf32, #tpu.memory_space<vmem>>, %arg3: memref<1x16x8xf32, #tpu.memory_space<vmem>>, %arg4: memref<1x16x8xf32, #tpu.memory_space<vmem>>, %arg5: memref<16x16xf32, #tpu.memory_space<vmem>>, %arg6: memref<16x16xf32, #tpu.memory_space<vmem>>, %arg7: memref<128x128xf32, #tpu.memory_space<vmem>>, %arg8: memref<128x128xf32, #tpu.memory_space<vmem>>, %arg9: memref<128x128xf32, #tpu.memory_space<vmem>>, %arg10: memref<16x128xf32, #tpu.memory_space<vmem>>, %arg11: memref<16x128xf32, #tpu.memory_space<vmem>>, %arg12: memref<1x1x16x128xf32, #tpu.memory_space<vmem>>) attributes {dimension_semantics = [#tpu.dimension_semantics<parallel>, #tpu.dimension_semantics<parallel>], iteration_bounds = array<i64: 1, 2>, scalar_prefetch = 0 : i64, scratch_operands = 0 : i64, tpu.core_type = #tpu.core_type<tc>, window_params = [{transform_indices = @transform_0, window_bounds = array<i64: 1, 1, 8, 128>}, {transform_indices = @transform_1, window_bounds = array<i64: 1, 16, 8>}, {transform_indices = @transform_2, window_bounds = array<i64: 1, 16, 8>}, {pipeline_mode = #tpu.pipeline_mode<synchronous>, transform_indices = @transform_3, window_bounds = array<i64: 16, 16>}, {pipeline_mode = #tpu.pipeline_mode<synchronous>, transform_indices = @transform_4, window_bounds = array<i64: 16, 16>}, {pipeline_mode = #tpu.pipeline_mode<synchronous>, transform_indices = @transform_5, window_bounds = array<i64: 128, 128>}, {pipeline_mode = #tpu.pipeline_mode<synchronous>, transform_indices = @transform_6, window_bounds = array<i64: 128, 128>}, {pipeline_mode = #tpu.pipeline_mode<synchronous>, transform_indices = @transform_7, window_bounds = array<i64: 128, 128>}, {pipeline_mode = #tpu.pipeline_mode<synchronous>, transform_indices = @transform_8, window_bounds = array<i64: 16, 128>}, {pipeline_mode = #tpu.pipeline_mode<synchronous>, transform_indices = @transform_9, window_bounds = array<i64: 16, 128>}, {transform_indices = @transform_10, window_bounds = array<i64: 1, 1, 16, 128>}]} {
    %c0 = arith.constant 0 : index
    %c0_0 = arith.constant 0 : index
    %c0_1 = arith.constant 0 : index
    %c0_2 = arith.constant 0 : index
    %0 = vector.load %arg2[%c0, %c0_0, %c0_1, %c0_2] : memref<1x1x8x128xf32, #tpu.memory_space<vmem>>, vector<1x1x8x128xf32>
    %1 = vector.shape_cast %0 : vector<1x1x8x128xf32> to vector<8x128xf32>
    %c0_3 = arith.constant 0 : index
    %c0_4 = arith.constant 0 : index
    %c0_5 = arith.constant 0 : index
    %2 = vector.load %arg3[%c0_3, %c0_4, %c0_5] : memref<1x16x8xf32, #tpu.memory_space<vmem>>, vector<1x16x8xf32>
    %3 = vector.shape_cast %2 : vector<1x16x8xf32> to vector<16x8xf32>
    %c0_6 = arith.constant 0 : index
    %c0_7 = arith.constant 0 : index
    %c0_8 = arith.constant 0 : index
    %4 = vector.load %arg4[%c0_6, %c0_7, %c0_8] : memref<1x16x8xf32, #tpu.memory_space<vmem>>, vector<1x16x8xf32>
    %5 = vector.shape_cast %4 : vector<1x16x8xf32> to vector<16x8xf32>
    %cst = arith.constant dense<0.000000e+00> : vector<16x128xf32>
    %6 = tpu.matmul %3, %1, %cst {dimension_numbers = #tpu.dot_dimension_numbers<[1], [0], [0], [1], [0, 0, 1, 1], [], []>} : vector<16x8xf32>, vector<8x128xf32>, vector<16x128xf32> -> vector<16x128xf32>
    %cst_9 = arith.constant dense<0.000000e+00> : vector<16x128xf32>
    %7 = tpu.matmul %5, %1, %cst_9 {dimension_numbers = #tpu.dot_dimension_numbers<[1], [0], [0], [1], [0, 0, 1, 1], [], []>} : vector<16x8xf32>, vector<8x128xf32>, vector<16x128xf32> -> vector<16x128xf32>
    %c0_10 = arith.constant 0 : index
    %c0_11 = arith.constant 0 : index
    %8 = vector.load %arg7[%c0_10, %c0_11] : memref<128x128xf32, #tpu.memory_space<vmem>>, vector<128x128xf32>
    %c0_12 = arith.constant 0 : index
    %c0_13 = arith.constant 0 : index
    %9 = vector.load %arg8[%c0_12, %c0_13] : memref<128x128xf32, #tpu.memory_space<vmem>>, vector<128x128xf32>
    %c0_14 = arith.constant 0 : index
    %c0_15 = arith.constant 0 : index
    %10 = vector.load %arg9[%c0_14, %c0_15] : memref<128x128xf32, #tpu.memory_space<vmem>>, vector<128x128xf32>
    %cst_16 = arith.constant dense<0.000000e+00> : vector<16x128xf32>
    %11 = tpu.matmul %6, %8, %cst_16 {dimension_numbers = #tpu.dot_dimension_numbers<[1], [0], [0], [1], [0, 0, 1, 1], [], []>} : vector<16x128xf32>, vector<128x128xf32>, vector<16x128xf32> -> vector<16x128xf32>
    %cst_17 = arith.constant dense<0.000000e+00> : vector<16x128xf32>
    %12 = tpu.matmul %7, %9, %cst_17 {dimension_numbers = #tpu.dot_dimension_numbers<[1], [0], [0], [1], [0, 0, 1, 1], [], []>} : vector<16x128xf32>, vector<128x128xf32>, vector<16x128xf32> -> vector<16x128xf32>
    %13 = arith.addf %6, %7 : vector<16x128xf32>
    %cst_18 = arith.constant dense<0.000000e+00> : vector<16x128xf32>
    %14 = tpu.matmul %13, %10, %cst_18 {dimension_numbers = #tpu.dot_dimension_numbers<[1], [0], [0], [1], [0, 0, 1, 1], [], []>} : vector<16x128xf32>, vector<128x128xf32>, vector<16x128xf32> -> vector<16x128xf32>
    %15 = arith.subf %11, %12 : vector<16x128xf32>
    %16 = arith.subf %14, %11 : vector<16x128xf32>
    %17 = arith.subf %16, %12 : vector<16x128xf32>
    %c0_19 = arith.constant 0 : index
    %c0_20 = arith.constant 0 : index
    %18 = vector.load %arg10[%c0_19, %c0_20] : memref<16x128xf32, #tpu.memory_space<vmem>>, vector<16x128xf32>
    %c0_21 = arith.constant 0 : index
    %c0_22 = arith.constant 0 : index
    %19 = vector.load %arg11[%c0_21, %c0_22] : memref<16x128xf32, #tpu.memory_space<vmem>>, vector<16x128xf32>
    %20 = arith.mulf %15, %18 : vector<16x128xf32>
    %21 = arith.mulf %17, %19 : vector<16x128xf32>
    %22 = arith.subf %20, %21 : vector<16x128xf32>
    %23 = arith.mulf %15, %19 : vector<16x128xf32>
    %24 = arith.mulf %17, %18 : vector<16x128xf32>
    %25 = arith.addf %23, %24 : vector<16x128xf32>
    %c0_23 = arith.constant 0 : index
    %c0_24 = arith.constant 0 : index
    %26 = vector.load %arg5[%c0_23, %c0_24] : memref<16x16xf32, #tpu.memory_space<vmem>>, vector<16x16xf32>
    %c0_25 = arith.constant 0 : index
    %c0_26 = arith.constant 0 : index
    %27 = vector.load %arg6[%c0_25, %c0_26] : memref<16x16xf32, #tpu.memory_space<vmem>>, vector<16x16xf32>
    %cst_27 = arith.constant dense<0.000000e+00> : vector<16x128xf32>
    %28 = tpu.matmul %26, %22, %cst_27 {dimension_numbers = #tpu.dot_dimension_numbers<[1], [0], [0], [1], [0, 0, 1, 1], [], []>} : vector<16x16xf32>, vector<16x128xf32>, vector<16x128xf32> -> vector<16x128xf32>
    %cst_28 = arith.constant dense<0.000000e+00> : vector<16x128xf32>
    %29 = tpu.matmul %27, %25, %cst_28 {dimension_numbers = #tpu.dot_dimension_numbers<[1], [0], [0], [1], [0, 0, 1, 1], [], []>} : vector<16x16xf32>, vector<16x128xf32>, vector<16x128xf32> -> vector<16x128xf32>
    %30 = arith.addf %28, %29 : vector<16x128xf32>
    %cst_29 = arith.constant dense<0.000000e+00> : vector<16x128xf32>
    %31 = tpu.matmul %26, %25, %cst_29 {dimension_numbers = #tpu.dot_dimension_numbers<[1], [0], [0], [1], [0, 0, 1, 1], [], []>} : vector<16x16xf32>, vector<16x128xf32>, vector<16x128xf32> -> vector<16x128xf32>
    %cst_30 = arith.constant dense<0.000000e+00> : vector<16x128xf32>
    %32 = tpu.matmul %27, %22, %cst_30 {dimension_numbers = #tpu.dot_dimension_numbers<[1], [0], [0], [1], [0, 0, 1, 1], [], []>} : vector<16x16xf32>, vector<16x128xf32>, vector<16x128xf32> -> vector<16x128xf32>
    %33 = arith.subf %31, %32 : vector<16x128xf32>
    %cst_31 = arith.constant dense<0.000000e+00> : vector<16x128xf32>
    %34 = tpu.matmul %30, %8, %cst_31 {dimension_numbers = #tpu.dot_dimension_numbers<[1], [0], [0], [1], [0, 0, 1, 1], [], []>} : vector<16x128xf32>, vector<128x128xf32>, vector<16x128xf32> -> vector<16x128xf32>
    %cst_32 = arith.constant dense<0.000000e+00> : vector<16x128xf32>
    %35 = tpu.matmul %33, %9, %cst_32 {dimension_numbers = #tpu.dot_dimension_numbers<[1], [0], [0], [1], [0, 0, 1, 1], [], []>} : vector<16x128xf32>, vector<128x128xf32>, vector<16x128xf32> -> vector<16x128xf32>
    %36 = arith.addf %34, %35 : vector<16x128xf32>
    %c0_33 = arith.constant 0 : index
    %c0_34 = arith.constant 0 : index
    %c0_35 = arith.constant 0 : index
    %c0_36 = arith.constant 0 : index
    %37 = vector.load %arg12[%c0_33, %c0_34, %c0_35, %c0_36] : memref<1x1x16x128xf32, #tpu.memory_space<vmem>>, vector<1x1x16x128xf32>
    %38 = vector.shape_cast %37 : vector<1x1x16x128xf32> to vector<16x128xf32>
    %39 = vector.shape_cast %36 : vector<16x128xf32> to vector<1x1x16x128xf32>
    tpu.vector_store %arg12[%c0_33, %c0_34, %c0_35, %c0_36], %39 {strides = array<i32>} : memref<1x1x16x128xf32, #tpu.memory_space<vmem>>, vector<1x1x16x128xf32>,
    return
  }
  func.func @transform_0(%arg0: i32, %arg1: i32) -> (i32, i32, i32, i32) {
    %c0_i32 = arith.constant 0 : i32
    %c0_i32_0 = arith.constant 0 : i32
    %c0_i32_1 = arith.constant 0 : i32
    return %arg0, %arg1, %c0_i32, %c0_i32_0 : i32, i32, i32, i32
  }
  func.func @transform_1(%arg0: i32, %arg1: i32) -> (i32, i32, i32) {
    %c0_i32 = arith.constant 0 : i32
    %c0_i32_0 = arith.constant 0 : i32
    %c0_i32_1 = arith.constant 0 : i32
    return %arg1, %c0_i32, %c0_i32_0 : i32, i32, i32
  }
  func.func @transform_2(%arg0: i32, %arg1: i32) -> (i32, i32, i32) {
    %c0_i32 = arith.constant 0 : i32
    %c0_i32_0 = arith.constant 0 : i32
    %c0_i32_1 = arith.constant 0 : i32
    return %arg1, %c0_i32, %c0_i32_0 : i32, i32, i32
  }
  func.func @transform_3(%arg0: i32, %arg1: i32) -> (i32, i32) {
    %c0_i32 = arith.constant 0 : i32
    %c0_i32_0 = arith.constant 0 : i32
    %c0_i32_1 = arith.constant 0 : i32
    return %c0_i32, %c0_i32_0 : i32, i32
  }
  func.func @transform_4(%arg0: i32, %arg1: i32) -> (i32, i32) {
    %c0_i32 = arith.constant 0 : i32
    %c0_i32_0 = arith.constant 0 : i32
    %c0_i32_1 = arith.constant 0 : i32
    return %c0_i32, %c0_i32_0 : i32, i32
  }
  func.func @transform_5(%arg0: i32, %arg1: i32) -> (i32, i32) {
    %c0_i32 = arith.constant 0 : i32
    %c0_i32_0 = arith.constant 0 : i32
    %c0_i32_1 = arith.constant 0 : i32
    return %c0_i32, %c0_i32_0 : i32, i32
  }
  func.func @transform_6(%arg0: i32, %arg1: i32) -> (i32, i32) {
    %c0_i32 = arith.constant 0 : i32
    %c0_i32_0 = arith.constant 0 : i32
    %c0_i32_1 = arith.constant 0 : i32
    return %c0_i32, %c0_i32_0 : i32, i32
  }
  func.func @transform_7(%arg0: i32, %arg1: i32) -> (i32, i32) {
    %c0_i32 = arith.constant 0 : i32
    %c0_i32_0 = arith.constant 0 : i32
    %c0_i32_1 = arith.constant 0 : i32
    return %c0_i32, %c0_i32_0 : i32, i32
  }
  func.func @transform_8(%arg0: i32, %arg1: i32) -> (i32, i32) {
    %c0_i32 = arith.constant 0 : i32
    %c0_i32_0 = arith.constant 0 : i32
    %c0_i32_1 = arith.constant 0 : i32
    return %c0_i32, %c0_i32_0 : i32, i32
  }
  func.func @transform_9(%arg0: i32, %arg1: i32) -> (i32, i32) {
    %c0_i32 = arith.constant 0 : i32
    %c0_i32_0 = arith.constant 0 : i32
    %c0_i32_1 = arith.constant 0 : i32
    return %c0_i32, %c0_i32_0 : i32, i32
  }
  func.func @transform_10(%arg0: i32, %arg1: i32) -> (i32, i32, i32, i32) {
    %c0_i32 = arith.constant 0 : i32
    %c0_i32_0 = arith.constant 0 : i32
    %c0_i32_1 = arith.constant 0 : i32
    return %arg1, %arg0, %c0_i32, %c0_i32_0 : i32, i32, i32, i32
  }
}

</mosaic_0001>

<bundles_post_ra>
// kernel: tpu_custom_call.1
= control target key start
LH: loop header
LB: loop body
LE: loop exit
PB: predicated region body
PF: predicated region fallthrough
CT: control target
= control target key end

     0   :  { %s2771_s0 = inlined_call_operand.vmem [shape: f32[1,2,8,128], index: 0, kind: input, shape index: {}]   ;;  %s2772_s1 = inlined_call_operand.vmem [shape: f32[2,16,8], index: 1, kind: input, shape index: {}]   ;;  %s2773_s2 = inlined_call_operand.vmem [shape: f32[2,16,8], index: 2, kind: input, shape index: {}]   ;;  %s2774_s3 = inlined_call_operand.vmem [shape: f32[16,16], index: 3, kind: input, shape index: {}]   ;;  %s2775_s4 = inlined_call_operand.vmem [shape: f32[16,16], index: 4, kind: input, shape index: {}]   ;;  %s2776_s5 = inlined_call_operand.hbm [shape: f32[128,128], index: 5, kind: input, shape index: {}]   ;;  %s2777_s6 = inlined_call_operand.hbm [shape: f32[128,128], index: 6, kind: input, shape index: {}]   ;;  %s2778_s7 = inlined_call_operand.hbm [shape: f32[128,128], index: 7, kind: input, shape index: {}]   ;;  %s2779_s8 = inlined_call_operand.vmem [shape: f32[16,128], index: 8, kind: input, shape index: {}]   ;;  %s2780_s9 = inlined_call_operand.vmem [shape: f32[16,128], index: 9, kind: input, shape index: {}]   ;;  %s2781_s10 = inlined_call_operand.hbm [shape: f32[2,1,16,128], index: 10, kind: output, shape index: {}]  }
   0x1   :  { %2793 = sst [smem:[#allocation19_spill]] %s2777_s6 }
   0x2   :  { %15 = vsyncpa [#allocation3], 0 }
   0x3   :  { %16 = vsyncpa [#allocation6], 0 }
   0x4   :  { %17 = vsyncpa [#allocation4], 0 }
   0x5   :  { %19 = vsyncpa [#allocation4 + $0x1], 0  ;;  %s2420_s13 = smov 0   ;;  %s2422_s14 = smov 0  }
   0x6   :  { %s2424_s15 = smov 0   ;;  %s2426_s16 = smov 0  }
   0x7   :  { %s2428_s17 = smov 0   ;;  %s2430_s18 = smov 0  }
   0x8 LB: > { %2794 = sst [smem:[#allocation12_spill]] %s2335_s13  ;;  %s1553_s19 = sadd.s32 4294967295, %s2355_s18   ;;  %s2355_s18 = sphi %s2430_s18, %s25_s18   ;;  %s2351_s17 = sphi %s2428_s17, %s2822_s17   ;;  %s2347_s16 = sphi %s2426_s16, %s2821_s16   ;;  %s2343_s15 = sphi %s2424_s15, %s2816_s15   ;;  %s2339_s14 = sphi %s2422_s14, %s2820_s14   ;;  %s2335_s13 = sphi %s2420_s13, %s2819_s13  }
   0x9   : > { %2795 = sst [smem:[#allocation13_spill]] %s2343_s15  ;;  %s1554_s20 = sadd.s32 4294967294, %s2355_s18  }
   0xa   : > { %2796 = sst [smem:[#allocation14_spill]] %s2351_s17  ;;  %s34_s21 = sadd.s32 1, %s2351_s17 }
   0xb   : > { %2797 = sst [smem:[#allocation15_spill]] %s2355_s18  ;;  %s273_s22 = sadd.s32 1, %s2343_s15 }
   0xc   : > { %p35_p0 = scmp.ge.s32.totalorder %s34_s21, 2  ;;  %p283_p1 = scmp.ne.s32.totalorder %s2343_s15, %s2339_s14 }
   0xd   : > { %p284_p2 = scmp.eq.s32.totalorder %s1553_s19, 1  ;;  %p289_p3 = scmp.ne.s32.totalorder %s2339_s14, %s2335_s13 }
   0xe   : > { %s2824_s21 = smov (%p35_p0, %s34_s21), 0  ;;  %p290_p5 = scmp.eq.s32.totalorder %s1554_s20, 1 }
   0xf   : > { %2798 = sst [smem:[#allocation16_spill]] %s2824_s21  ;;  %p2460_p4 = por %p284_p2, %p283_p1 }
  0x10   : > { %s268_s24 = ssub.s32 %s2351_s17, %s2824_s21  ;;  %p1555_p6 = scmp.ge.s32.totalorder %s2355_s18, 1 }
  0x11   : > { %s2799_s23 = scalar_select %p2460_p4, 1, 0 }
  0x12   : > { %p271_p7 = scmp.eq.s32.totalorder %s268_s24, 0  ;;  %p2467_p8 = por %p290_p5, %p289_p3 }
  0x13   : > { %p297_p9 = scmp.lt.s32.totalorder %s2355_s18, 3  ;;  %p2479_p11 = scmp.eq.s32.totalorder %s1553_s19, 0 }
  0x14   : > { %s2800_s25 = scalar_select %p2467_p8, 1, 0 }
  0x15   : > { %s2473_s26 = scalar_select %p271_p7, %s2343_s15, %s273_s22  }
  0x16   : > { %2801 = sst [smem:[#allocation17_spill]] %s2800_s25  ;;  %p2475_p10 = pnand %p1555_p6, %p297_p9 }
  0x17   : > { %2802 = sst [smem:[#allocation18_spill]] %s2473_s26  ;;  %s2357_s29 = smov [#allocation5]  }
  0x18   : > { %s2803_s27 = scalar_select %p2475_p10, 1, 0 }
  0x19   : > { %s2804_s28 = scalar_select %p2479_p11, 1, 0 }
  0x1a   : > { %p2109_p12 = pneg %p2475_p10  ;;  %s328_s30 = sshll.u32 %s2357_s29, 4  ;;  %s329_s30 = int_to_ptr.vmem [resolvable:$true] %s328_s30 }
  0x1b   : > { %s2358_s12 = smov [#allocation2]   ;;  %s2806_s6 = sld [smem:[#allocation19_spill]] }
  0x1c   : > { %p2487_p13 = pnand %p2479_p11, %p2109_p12  ;;  %s315_s20 = sshll.u32 %s2358_s12, 4  ;;  %s316_s20 = int_to_ptr.vmem [resolvable:$true] %s315_s20 }
  0x1e   : > { %p2499_p1 = pneg %p2487_p13 }
  0x21   : > { %s2185_s19 = scalar_lea.hbm %s2806_s6, 2048 }
  0x22   : > { %p2186_p0 = scmp.ne.s32.totalorder %s2806_s6, %s2185_s19  ;;  %p2192_p5 = scmp.lt.u32.totalorder %s2185_s19, %s2806_s6 }
  0x24   : > { %p2188_p2 = pnand %p2499_p1, %p2186_p0 }
  0x26   : > { %p2189_p3 = pneg %p2188_p2 }
  0x28   : > { %p2194_p6 = pnand %p2192_p5, %p2189_p3 }
  0x2a   : > { %2197 = shalt.err (!%p2194_p6)
}
  0x2b   : > { %s2198_s12 = scalar_lea.vmem %s329_s30, 2048  ;;  %p2206_p8 = scmp.lt.s32.totalorder %s329_s30, %s329_s30 }
  0x2c   : > { %p2199_p7 = scmp.ne.s32.totalorder %s329_s30, %s2198_s12  ;;  %p2207_p4 = scmp.lt.s32.totalorder %s2198_s12, %s2198_s12 }
  0x2e   : > { %p2201_p9 = pnand %p2199_p7, %p2499_p1  ;;  %p2208_p11 = por %p2207_p4, %p2206_p8 }
  0x30   : > { %p2202_p12 = pneg %p2201_p9 }
  0x32   : > { %p2209_p10 = pnand %p2208_p11, %p2202_p12 }
  0x34   : > { %2212 = shalt.err (!%p2209_p10)
}
  0x35   : > { %s2359_s17 = smov 128   ;;  %s2360_s21 = smov 8  }
  0x36   : > { %2115 = dma.hbm_to_vmem [thread:$0]  (!%p2487_p13), %s2806_s6, 2048, %s329_s30, [#allocation6], %s2359_s17, %s2359_s17, %s2360_s21  }
  0x37   : > { %s2213_s19 = scalar_lea.hbm %s2776_s5, 2048 }
  0x38   : > { %p2214_p4 = scmp.ne.s32.totalorder %s2776_s5, %s2213_s19  ;;  %p2220_p11 = scmp.lt.u32.totalorder %s2213_s19, %s2776_s5 }
  0x3a   : > { %p2216_p8 = pnand %p2214_p4, %p2499_p1 }
  0x3c   : > { %p2217_p10 = pneg %p2216_p8 }
  0x3e   : > { %p2222_p0 = pnand %p2220_p11, %p2217_p10 }
  0x40   : > { %2225 = shalt.err (!%p2222_p0)
}
  0x41   : > { %s2226_s15 = scalar_lea.vmem %s316_s20, 2048  ;;  %p2234_p6 = scmp.lt.s32.totalorder %s316_s20, %s316_s20 }
  0x42   : > { %p2227_p2 = scmp.ne.s32.totalorder %s316_s20, %s2226_s15  ;;  %p2235_p7 = scmp.lt.s32.totalorder %s2226_s15, %s2226_s15 }
  0x44   : > { %p2229_p3 = pnand %p2227_p2, %p2499_p1  ;;  %p2236_p9 = por %p2235_p7, %p2234_p6 }
  0x46   : > { %p2230_p5 = pneg %p2229_p3 }
  0x48   : > { %p2237_p12 = pnand %p2236_p9, %p2230_p5 }
  0x4a   : > { %2240 = shalt.err (!%p2237_p12)
}
  0x4b   : > { %2112 = dma.hbm_to_vmem [thread:$0]  (!%p2487_p13), %s2776_s5, 2048, %s316_s20, [#allocation3], %s2359_s17, %s2359_s17, %s2360_s21  }
  0x4c   : > { %s2361_s25 = smov [#allocation7]   ;;  %s2241_s24 = scalar_lea.hbm %s2778_s7, 2048 }
  0x4d   : > { %s341_s30 = sshll.u32 %s2361_s25, 4  ;;  %p2242_p4 = scmp.ne.s32.totalorder %s2778_s7, %s2241_s24  ;;  %s342_s30 = int_to_ptr.vmem [resolvable:$true] %s341_s30 }
  0x4e   : > { %p2248_p11 = scmp.lt.u32.totalorder %s2241_s24, %s2778_s7 }
  0x4f   : > { %p2244_p8 = pnand %p2242_p4, %p2499_p1 }
  0x51   : > { %p2245_p10 = pneg %p2244_p8 }
  0x53   : > { %p2250_p0 = pnand %p2248_p11, %p2245_p10 }
  0x55   : > { %2253 = shalt.err (!%p2250_p0)
}
  0x56   : > { %s2254_s20 = scalar_lea.vmem %s342_s30, 2048  ;;  %p2262_p6 = scmp.lt.s32.totalorder %s342_s30, %s342_s30 }
  0x57   : > { %p2255_p2 = scmp.ne.s32.totalorder %s342_s30, %s2254_s20  ;;  %p2263_p7 = scmp.lt.s32.totalorder %s2254_s20, %s2254_s20 }
  0x59   : > { %p2257_p3 = pnand %p2255_p2, %p2499_p1  ;;  %p2264_p9 = por %p2263_p7, %p2262_p6 }
  0x5b   : > { %p2258_p5 = pneg %p2257_p3 }
  0x5d   : > { %p2265_p12 = pnand %p2264_p9, %p2258_p5 }
  0x5f   : > { %2268 = shalt.err (!%p2265_p12)
}
  0x60   : > { %2118 = dma.hbm_to_vmem [thread:$0]  (!%p2487_p13), %s2778_s7, 2048, %s342_s30, [#allocation6], %s2359_s17, %s2359_s17, %s2360_s21  }
  0x61   : > { %p2808_p4 = scmp.ne.s32.totalorder %s2803_s27, 0 }
  0x62   : > { %p2809_p1 = scmp.ne.s32.totalorder (!%p2808_p4), %s2804_s28, 0 }
  0x63   : > { %390 = sbr.rel (%p2808_p4) target bundleno = 1115 (0x45b), region = 60 }
  0x6a   : > { %2322 = dma.done.wait (%p2809_p1), [#allocation3], 2048  }
  0x6b   : > { %2324 = vsyncadd (%p2809_p1), [#allocation3], 4294965248 }
  0x6c   : > { %2326 = dma.done.wait (%p2809_p1), [#allocation6], 4096  }
  0x6d   : > { %2328 = vsyncadd (%p2809_p1), [#allocation6], 4294963200  ;;  %p451_p8 = scmp.lt.s32.totalorder %s2347_s16, 1  ;;  %vm472_vm0 = vcmask 64512   ;;  %v635_v4 = vld [vmem:[#allocation2] sm:$0xff]  ;;  %v636_v5 = vld [vmem:[#allocation2 + $0x8] sm:$0xff] }
  0x6e   : > { %v637_v6 = vld [vmem:[#allocation2 + $0x10] sm:$0xff]  ;;  %v638_v7 = vld [vmem:[#allocation2 + $0x18] sm:$0xff]  ;;  %v2583_v8 = vpack.c.bf16 %v636_v5, %v635_v4  ;;  %v639_v11 = vld [vmem:[#allocation2 + $0x20] sm:$0xff]  ;;  %vm936_vm1 = vcmask 130048   ;;  %s446_s24 = sand.u32 1, %s2339_s14   ;;  %s1589_s15 = sshll.u32 %s2347_s16, 8 }
  0x6f   : > { %s452_s11 = scalar_select %p451_p8, %s2347_s16, 1  ;;  %v2585_v9 = vpack.c.bf16 %v638_v7, %v637_v6  ;;  %v640_v12 = vld [vmem:[#allocation2 + $0x28] sm:$0xff]  ;;  %v641_v14 = vld [vmem:[#allocation2 + $0x30] sm:$0xff]  ;;  %v642_v15 = vld [vmem:[#allocation2 + $0x38] sm:$0xff] }
  0x70   : > { %1916 = vmatprep.subr.bf16.mxu0 %v2583_v8  ;;  %v2592_v13 = vpack.c.bf16 %v640_v12, %v639_v11  ;;  %v2596_v16 = vpack.c.bf16 %v642_v15, %v641_v14  ;;  %v643_v17 = vld [vmem:[#allocation2 + $0x40] sm:$0xff]  ;;  %v644_v18 = vld [vmem:[#allocation2 + $0x48] sm:$0xff]  ;;  %v645_v20 = vld [vmem:[#allocation2 + $0x50] sm:$0xff]  ;;  %s2723_s13 = scalar_lea.hbm %s2781_s10, %s1589_s15  ;;  %p2810_p10 = scmp.ne.s32.totalorder %s2799_s23, 0 }
  0x71   : > { %s1565_s29 = sshll.u32 %s452_s11, 3  ;;  %s1587_s17 = sshll.u32 %s452_s11, 4  ;;  %1918 = vmatpush3.bf16.msra.mxu0 %v2583_v8  ;;  %v2600_v19 = vpack.c.bf16 %v644_v18, %v643_v17  ;;  %v646_v21 = vld [vmem:[#allocation2 + $0x58] sm:$0xff]  ;;  %v647_v23 = vld [vmem:[#allocation2 + $0x60] sm:$0xff]  ;;  %v648_v24 = vld [vmem:[#allocation2 + $0x68] sm:$0xff] }
  0x72   : > { %s456_s18 = scalar_lea.vmem %s2771_s0, %s1565_s29  ;;  %s461_s26 = scalar_lea.vmem %s2772_s1, %s1587_s17  ;;  %1920 = vmatprep.subr.bf16.mxu0 %v2585_v9  ;;  %v2604_v22 = vpack.c.bf16 %v646_v21, %v645_v20  ;;  %v2608_v25 = vpack.c.bf16 %v648_v24, %v647_v23  ;;  %v649_v26 = vld [vmem:[#allocation2 + $0x70] sm:$0xff]  ;;  %v650_v27 = vld [vmem:[#allocation2 + $0x78] sm:$0xff]  ;;  %v651_v29 = vld [vmem:[#allocation5] sm:$0xff] }
  0x73   : > { %s466_s28 = scalar_lea.vmem %s2773_s2, %s1587_s17  ;;  %v467_v0 = vld [vmem:[%s456_s18] sm:$0xff]  ;;  %v469_v2 = vld [vmem:[%s461_s26 + $0x8] sm:$0xff]  ;;  %v2612_v28 = vpack.c.bf16 %v650_v27, %v649_v26  ;;  %v653_v32 = vld [vmem:[#allocation5 + $0x10] sm:$0xff]  ;;  %s2725_s11 = scalar_lea.sflag [#allocation4], %s446_s24 }
  0x74   : > { %v468_v1 = vld [vmem:[%s461_s26] sm:$0xff]  ;;  %1702 = vmatprep.subr.mxu1 %v467_v0  ;;  %v471_v10 = vld [vmem:[%s466_s28 + $0x8] sm:$0xff]  ;;  %v654_v33 = vld [vmem:[#allocation5 + $0x18] sm:$0xff]  ;;  %s2362_s16 = smov [#allocation8]  }
  0x75   : > { %1704 = vmatprep.mubr.msk.f32.mxu1 %vm472_vm0, %v468_v1  ;;  %v470_v3 = vld [vmem:[%s466_s28] sm:$0xff]  ;;  %1703 = vmatpush3.msra.mxu1 %v467_v0  ;;  %v652_v30 = vld [vmem:[#allocation5 + $0x8] sm:$0xff]  ;;  %v2620_v36 = vpack.c.bf16 %v654_v33, %v653_v32  ;;  %v657_v44 = vld [vmem:[#allocation5 + $0x30] sm:$0xff]  ;;  %s1564_s28 = sshll.u32 %s446_s24, 4  ;;  %s2273_s17 = sshll.u32 %s2362_s16, 4  ;;  %s2274_s17 = int_to_ptr.vmem [resolvable:$false] %s2273_s17 }
  0x76   : > { %1705 = vmatmul.mubr.msk.f32.vlgmr.msra.gmra.mrb[0].mxu1 %vm472_vm0, %v469_v2  ;;  %1707 = vmatprep.subr.mxu1 %v467_v0  ;;  %v2617_v31 = vpack.c.bf16 %v652_v30, %v651_v29  ;;  %v655_v37 = vld [vmem:[#allocation5 + $0x20] sm:$0xff]  ;;  %v656_v38 = vld [vmem:[#allocation5 + $0x28] sm:$0xff]  ;;  %v658_v45 = vld [vmem:[#allocation5 + $0x38] sm:$0xff]  ;;  %s448_s19 = scalar_lea.vmem [#allocation8], %s1564_s28  ;;  %s2275_s27 = scalar_lea.vmem %s2274_s17, 512 }
  0x77   : > { %1708 = vmatpush3.msra.mxu1 %v467_v0  ;;  %1709 = vmatprep.mubr.msk.f32.mxu1 %vm472_vm0, %v470_v3  ;;  %v2626_v42 = vpack.c.bf16 %v656_v38, %v655_v37  ;;  %v2630_v46 = vpack.c.bf16 %v658_v45, %v657_v44  ;;  %v659_v47 = vld [vmem:[#allocation5 + $0x40] sm:$0xff]  ;;  %v660_v48 = vld [vmem:[#allocation5 + $0x48] sm:$0xff]  ;;  %v661_v50 = vld [vmem:[#allocation5 + $0x50] sm:$0xff]  ;;  %s1419_s12 = sshll.u32 %s448_s19, 4  ;;  %s2718_s12 = int_to_ptr.vmem [resolvable:$true] %s1419_s12 }
  0x78   : > { %1922 = vmatpush3.bf16.msra.mxu0 %v2585_v9  ;;  %v2634_v49 = vpack.c.bf16 %v660_v48, %v659_v47  ;;  %v662_v51 = vld [vmem:[#allocation5 + $0x58] sm:$0xff]  ;;  %v663_v53 = vld [vmem:[#allocation5 + $0x60] sm:$0xff]  ;;  %v664_v54 = vld [vmem:[#allocation5 + $0x68] sm:$0xff]  ;;  %s2269_s29 = scalar_lea.vmem %s2718_s12, 256  ;;  %p2276_p2 = scmp.lt.s32.totalorder %s2718_s12, %s2274_s17 }
  0x79   : > { %1924 = vmatprep.subr.bf16.mxu0 %v2592_v13  ;;  %v2638_v52 = vpack.c.bf16 %v662_v51, %v661_v50  ;;  %v2642_v55 = vpack.c.bf16 %v664_v54, %v663_v53  ;;  %v665_v56 = vld [vmem:[#allocation5 + $0x70] sm:$0xff]  ;;  %v666_v57 = vld [vmem:[#allocation5 + $0x78] sm:$0xff]  ;;  %v667_v59 = vld [vmem:[#allocation7] sm:$0xff]  ;;  %p2270_p13 = scmp.ne.s32.totalorder %s2718_s12, %s2269_s29  ;;  %p2277_p3 = scmp.lt.s32.totalorder %s2275_s27, %s2269_s29 }
  0x7a   : > { %1710 = vmatmul.mubr.msk.f32.vlgmr.msra.gmra.mrb[2].mxu1 %vm472_vm0, %v471_v10  ;;  %v2646_v58 = vpack.c.bf16 %v666_v57, %v665_v56  ;;  %v668_v60 = vld [vmem:[#allocation7 + $0x8] sm:$0xff]  ;;  %v669_v62 = vld [vmem:[#allocation7 + $0x10] sm:$0xff]  ;;  %v670_v63 = vld [vmem:[#allocation7 + $0x18] sm:$0xff] }
  0x7b   : > { %v1979_v61 = vpack.c.bf16 %v668_v60, %v667_v59  ;;  %v1983_v0 = vpack.c.bf16 %v670_v63, %v669_v62  ;;  %v671_v1 = vld [vmem:[#allocation7 + $0x20] sm:$0xff]  ;;  %v672_v2 = vld [vmem:[#allocation7 + $0x28] sm:$0xff]  ;;  %v673_v4 = vld [vmem:[#allocation7 + $0x30] sm:$0xff]  ;;  %p2271_p11 = pnand %p2270_p13, %p2810_p10  ;;  %p2278_p5 = por %p2277_p3, %p2276_p2 }
  0x7c   : > { %1926 = vmatpush3.bf16.msra.mxu0 %v2592_v13  ;;  %v1987_v3 = vpack.c.bf16 %v672_v2, %v671_v1  ;;  %v674_v5 = vld [vmem:[#allocation7 + $0x38] sm:$0xff]  ;;  %v675_v7 = vld [vmem:[#allocation7 + $0x40] sm:$0xff]  ;;  %v676_v10 = vld [vmem:[#allocation7 + $0x48] sm:$0xff] }
  0x7d   : > { %1928 = vmatprep.subr.bf16.mxu0 %v2596_v16  ;;  %v1991_v6 = vpack.c.bf16 %v674_v5, %v673_v4  ;;  %v1995_v11 = vpack.c.bf16 %v676_v10, %v675_v7  ;;  %v677_v12 = vld [vmem:[#allocation7 + $0x50] sm:$0xff]  ;;  %v678_v14 = vld [vmem:[#allocation7 + $0x58] sm:$0xff]  ;;  %v679_v17 = vld [vmem:[#allocation7 + $0x60] sm:$0xff]  ;;  %p2272_p0 = pneg %p2271_p11 }
  0x7e   : > { %v1999_v15 = vpack.c.bf16 %v678_v14, %v677_v12  ;;  %v680_v18 = vld [vmem:[#allocation7 + $0x68] sm:$0xff]  ;;  %v681_v21 = vld [vmem:[#allocation7 + $0x70] sm:$0xff]  ;;  %v682_v23 = vld [vmem:[#allocation7 + $0x78] sm:$0xff] }
  0x7f   : > { %v2003_v20 = vpack.c.bf16 %v680_v18, %v679_v17  ;;  %v2007_v24 = vpack.c.bf16 %v682_v23, %v681_v21  ;;  %v934_v26 = vld [vmem:[%s2775_s4] sm:$0xff]  ;;  %v935_v2 = vld [vmem:[%s2775_s4 + $0x8] sm:$0xff]  ;;  %p2279_p6 = pnand %p2278_p5, %p2272_p0 }
  0x80   : > { %1930 = vmatpush3.bf16.msra.mxu0 %v2596_v16  ;;  %1821 = vmatprep.mubr.msk.f32.mxu1 %vm936_vm1, %v934_v26  ;;  %v918_v44 = vld [vmem:[%s2780_s9] sm:$0xff]  ;;  %v933_v4 = vld [vmem:[%s2774_s3 + $0x8] sm:$0xff] }
  0x81   : > { %1932 = vmatprep.subr.bf16.mxu0 %v2600_v19 }
  0x84   : > { %1934 = vmatpush3.bf16.msra.mxu0 %v2600_v19 }
  0x85   : > { %1936 = vmatprep.subr.bf16.mxu0 %v2604_v22 }
  0x88   : > { %1938 = vmatpush3.bf16.msra.mxu0 %v2604_v22 }
  0x89   : > { %1940 = vmatprep.subr.bf16.mxu0 %v2608_v25 }
  0x8c   : > { %1942 = vmatpush3.bf16.msra.mxu0 %v2608_v25 }
  0x8d   : > { %1944 = vmatprep.subr.bf16.mxu0 %v2612_v28 }
  0x90   : > { %1946 = vmatpush3.bf16.msra.mxu0 %v2612_v28 }
  0x91   : > { %1948 = vmatprep.subr.bf16.mxu0 %v2617_v31 }
 0x149   : > { %v1706_v34 = vpop.f32.mrb[0].mxu1 }
 0x14a   : > { %v545_v35 = vpop.f32.mrb[1].mxu1 }
 0x14b   : > { %1744 = vmatprep.mubr.f32.mxu0 %v545_v35 }
 0x14c   : > { %1745 = vmatmul.mubr.f32.vlgmr.msra.gmra.mrb[0].mxu0 %v1706_v34 }
 0x14d   : > { %1950 = vmatpush3.bf16.msra.mxu0 %v2617_v31  ;;  %v1711_v39 = vpop.f32.mrb[2].mxu1 }
 0x14e   : > { %v2623_v40 = vadd.f32 %v1711_v39, %v1706_v34  ;;  %v626_v41 = vpop.f32.mrb[3].mxu1  ;;  %1952 = vmatprep.subr.bf16.mxu0 %v2620_v36 }
 0x14f   : > { %v833_v43 = vadd.f32 %v626_v41, %v545_v35  ;;  %1779 = vmatprep.mubr.f32.mxu0 %v626_v41 }
 0x151   : > { %1954 = vmatpush3.bf16.msra.mxu0 %v2620_v36 }
 0x152   : > { %1956 = vmatprep.subr.bf16.mxu0 %v2626_v42 }
 0x155   : > { %1958 = vmatpush3.bf16.msra.mxu0 %v2626_v42 }
 0x156   : > { %1960 = vmatprep.subr.bf16.mxu0 %v2630_v46 }
 0x159   : > { %1962 = vmatpush3.bf16.msra.mxu0 %v2630_v46 }
 0x15a   : > { %1964 = vmatprep.subr.bf16.mxu0 %v2634_v49 }
 0x15d   : > { %1966 = vmatpush3.bf16.msra.mxu0 %v2634_v49 }
 0x15e   : > { %1968 = vmatprep.subr.bf16.mxu0 %v2638_v52 }
 0x161   : > { %1970 = vmatpush3.bf16.msra.mxu0 %v2638_v52 }
 0x162   : > { %1972 = vmatprep.subr.bf16.mxu0 %v2642_v55 }
 0x165   : > { %1974 = vmatpush3.bf16.msra.mxu0 %v2642_v55 }
 0x166   : > { %1976 = vmatprep.subr.bf16.mxu0 %v2646_v58 }
 0x169   : > { %1978 = vmatpush3.bf16.msra.mxu0 %v2646_v58 }
 0x16a   : > { %1980 = vmatprep.subr.bf16.mxu0 %v1979_v61 }
 0x16c   : > { %1780 = vmatmul.mubr.f32.vlgmr.msra.gmra.mrb[2].mxu0 %v1711_v39  ;;  %v917_v39 = vld [vmem:[%s2779_s8 + $0x8] sm:$0xff] }
 0x16d   : > { %1982 = vmatpush3.bf16.msra.mxu0 %v1979_v61  ;;  %1814 = vmatprep.mubr.f32.mxu0 %v833_v43  ;;  %v916_v43 = vld [vmem:[%s2779_s8] sm:$0xff] }
 0x16e   : > { %1984 = vmatprep.subr.bf16.mxu0 %v1983_v0 }
 0x171   : > { %1986 = vmatpush3.bf16.msra.mxu0 %v1983_v0 }
 0x172   : > { %1988 = vmatprep.subr.bf16.mxu0 %v1987_v3 }
 0x175   : > { %1990 = vmatpush3.bf16.msra.mxu0 %v1987_v3  ;;  %v932_v3 = vld [vmem:[%s2774_s3] sm:$0xff] }
 0x176   : > { %1992 = vmatprep.subr.bf16.mxu0 %v1991_v6 }
 0x179   : > { %1994 = vmatpush3.bf16.msra.mxu0 %v1991_v6 }
 0x17a   : > { %1996 = vmatprep.subr.bf16.mxu0 %v1995_v11 }
 0x17d   : > { %1998 = vmatpush3.bf16.msra.mxu0 %v1995_v11 }
 0x17e   : > { %2000 = vmatprep.subr.bf16.mxu0 %v1999_v15 }
 0x181   : > { %2002 = vmatpush3.bf16.msra.mxu0 %v1999_v15 }
 0x182   : > { %2004 = vmatprep.subr.bf16.mxu0 %v2003_v20 }
 0x185   : > { %2006 = vmatpush3.bf16.msra.mxu0 %v2003_v20 }
 0x186   : > { %2008 = vmatprep.subr.bf16.mxu0 %v2007_v24 }
 0x189   : > { %2010 = vmatpush3.bf16.msra.mxu0 %v2007_v24 }
 0x18c   : > { %1815 = vmatmul.mubr.f32.vlgmr.msra.gmra.mrb[4].mxu0 %v2623_v40  ;;  %v919_v40 = vld [vmem:[%s2780_s9 + $0x8] sm:$0xff] }
 0x21f   : > { %v1746_v27 = vpop.f32.mrb[0].mxu0 }
 0x220   : > { %v749_v29 = vpop.f32.mrb[1].mxu0 }
 0x23f   : > { %v1781_v30 = vpop.f32.mrb[2].mxu0 }
 0x240   : > { %v911_v32 = vsub.f32 %v1746_v27, %v1781_v30  ;;  %v824_v33 = vpop.f32.mrb[3].mxu0 }
 0x241   : > { %v910_v34 = vsub.f32 %v749_v29, %v824_v33 }
 0x242   : > { %v921_v48 = vmul.f32 %v917_v39, %v911_v32  ;;  %v927_v50 = vmul.f32 %v919_v40, %v911_v32 }
 0x243   : > { %v920_v54 = vmul.f32 %v916_v43, %v910_v34  ;;  %v926_v56 = vmul.f32 %v918_v44, %v910_v34 }
 0x25f   : > { %v1816_v35 = vpop.f32.mrb[4].mxu0 }
 0x260   : > { %v913_v37 = vsub.f32 %v1816_v35, %v1746_v27  ;;  %v901_v38 = vpop.f32.mrb[5].mxu0 }
 0x261   : > { %v912_v41 = vsub.f32 %v901_v38, %v749_v29 }
 0x262   : > { %v915_v45 = vsub.f32 %v913_v37, %v1781_v30 }
 0x263   : > { %v914_v47 = vsub.f32 %v912_v41, %v824_v33 }
 0x264   : > { %v923_v51 = vmul.f32 %v919_v40, %v915_v45  ;;  %v929_v53 = vmul.f32 %v917_v39, %v915_v45 }
 0x265   : > { %v922_v57 = vmul.f32 %v918_v44, %v914_v47  ;;  %v928_v59 = vmul.f32 %v916_v43, %v914_v47 }
 0x266   : > { %v925_v60 = vsub.f32 %v921_v48, %v923_v51  ;;  %v931_v61 = vadd.f32 %v929_v53, %v927_v50 }
 0x267   : > { %v924_v62 = vsub.f32 %v920_v54, %v922_v57  ;;  %v930_v63 = vadd.f32 %v928_v59, %v926_v56 }
 0x269   : > { %v2011_v0 = vpack.c.bf16 %v931_v61, %v930_v63  ;;  %v2015_v1 = vpack.c.bf16 %v925_v60, %v924_v62 }
 0x26b   : > { %2012 = vmatprep.subr.bf16.mxu1 %v2011_v0 }
 0x26c   : > { %2014 = vmatpush3.bf16.msra.mxu1 %v2011_v0 }
 0x26d   : > { %2016 = vmatprep.subr.bf16.mxu1 %v2015_v1 }
 0x26f   : > { %1822 = vmatmul.mubr.msk.f32.vlgmr.msra.gmra.mrb[4].mxu1 %vm936_vm1, %v935_v2 }
 0x270   : > { %2018 = vmatpush3.bf16.msra.mxu1 %v2015_v1  ;;  %1828 = vmatprep.mubr.msk.f32.mxu1 %vm936_vm1, %v932_v3 }
 0x271   : > { %2020 = vmatprep.subr.bf16.mxu1 %v2011_v0 }
 0x277   : > { %1829 = vmatmul.mubr.msk.f32.vlgmr.msra.gmra.mrb[4].mxu1 %vm936_vm1, %v933_v4 }
 0x278   : > { %2022 = vmatpush3.bf16.msra.mxu1 %v2011_v0  ;;  %1835 = vmatprep.mubr.msk.f32.mxu1 %vm936_vm1, %v932_v3 }
 0x279   : > { %2024 = vmatprep.subr.bf16.mxu1 %v2015_v1 }
 0x27b   : > { %1836 = vmatmul.mubr.msk.f32.vlgmr.msra.gmra.mrb[6].mxu1 %vm936_vm1, %v933_v4 }
 0x27c   : > { %2026 = vmatpush3.bf16.msra.mxu1 %v2015_v1  ;;  %1842 = vmatprep.mubr.msk.f32.mxu1 %vm936_vm1, %v934_v26 }
 0x27d   : > { %2028 = vmatprep.subr.bf16.mxu1 %v2617_v31 }
 0x27f   : > { %1843 = vmatmul.mubr.msk.f32.vlgmr.msra.gmra.mrb[8].mxu1 %vm936_vm1, %v935_v2 }
 0x280   : > { %2030 = vmatpush3.bf16.msra.mxu1 %v2617_v31 }
 0x281   : > { %2032 = vmatprep.subr.bf16.mxu1 %v2620_v36 }
 0x284   : > { %2034 = vmatpush3.bf16.msra.mxu1 %v2620_v36 }
 0x285   : > { %2036 = vmatprep.subr.bf16.mxu1 %v2626_v42 }
 0x288   : > { %2038 = vmatpush3.bf16.msra.mxu1 %v2626_v42 }
 0x289   : > { %2040 = vmatprep.subr.bf16.mxu1 %v2630_v46 }
 0x28c   : > { %2042 = vmatpush3.bf16.msra.mxu1 %v2630_v46 }
 0x28d   : > { %2044 = vmatprep.subr.bf16.mxu1 %v2634_v49 }
 0x290   : > { %2046 = vmatpush3.bf16.msra.mxu1 %v2634_v49 }
 0x291   : > { %2048 = vmatprep.subr.bf16.mxu1 %v2638_v52 }
 0x294   : > { %2050 = vmatpush3.bf16.msra.mxu1 %v2638_v52 }
 0x295   : > { %2052 = vmatprep.subr.bf16.mxu1 %v2642_v55 }
 0x298   : > { %2054 = vmatpush3.bf16.msra.mxu1 %v2642_v55 }
 0x299   : > { %2056 = vmatprep.subr.bf16.mxu1 %v2646_v58 }
 0x29c   : > { %2058 = vmatpush3.bf16.msra.mxu1 %v2646_v58 }
 0x29d   : > { %2060 = vmatprep.subr.bf16.mxu1 %v2583_v8 }
 0x34a   : > { %v1830_v31 = vpop.f32.mrb[4].mxu1 }
 0x34b   : > { %v1090_v36 = vpop.f32.mrb[5].mxu1 }
 0x34e   : > { %v1837_v42 = vpop.f32.mrb[6].mxu1 }
 0x34f   : > { %v1165_v46 = vpop.f32.mrb[7].mxu1 }
 0x352   : > { %v1844_v5 = vpop.f32.mrb[8].mxu1 }
 0x353   : > { %v1250_v49 = vsub.f32 %v1837_v42, %v1844_v5  ;;  %v1240_v6 = vpop.f32.mrb[9].mxu1 }
 0x354   : > { %v1249_v7 = vsub.f32 %v1165_v46, %v1240_v6 }
 0x356   : > { %1877 = vmatprep.mubr.f32.mxu1 %v1249_v7 }
 0x357   : > { %1878 = vmatmul.mubr.f32.vlgmr.msra.gmra.mrb[10].mxu1 %v1250_v49 }
 0x358   : > { %2062 = vmatpush3.bf16.msra.mxu1 %v2583_v8  ;;  %1912 = vmatprep.mubr.f32.mxu1 %v1090_v36 }
 0x359   : > { %2064 = vmatprep.subr.bf16.mxu1 %v2585_v9 }
 0x35c   : > { %2066 = vmatpush3.bf16.msra.mxu1 %v2585_v9 }
 0x35d   : > { %2068 = vmatprep.subr.bf16.mxu1 %v2592_v13 }
 0x360   : > { %2070 = vmatpush3.bf16.msra.mxu1 %v2592_v13 }
 0x361   : > { %2072 = vmatprep.subr.bf16.mxu1 %v2596_v16 }
 0x364   : > { %2074 = vmatpush3.bf16.msra.mxu1 %v2596_v16 }
 0x365   : > { %2076 = vmatprep.subr.bf16.mxu1 %v2600_v19 }
 0x368   : > { %2078 = vmatpush3.bf16.msra.mxu1 %v2600_v19 }
 0x369   : > { %2080 = vmatprep.subr.bf16.mxu1 %v2604_v22 }
 0x36c   : > { %2082 = vmatpush3.bf16.msra.mxu1 %v2604_v22 }
 0x36d   : > { %2084 = vmatprep.subr.bf16.mxu1 %v2608_v25 }
 0x370   : > { %2086 = vmatpush3.bf16.msra.mxu1 %v2608_v25 }
 0x371   : > { %2088 = vmatprep.subr.bf16.mxu1 %v2612_v28 }
 0x374   : > { %2090 = vmatpush3.bf16.msra.mxu1 %v2612_v28 }
 0x377   : > { %1913 = vmatmul.mubr.f32.vlgmr.msra.gmra.mrb[10].mxu1 %v1830_v31 }
 0x44a   : > { %v1914_v8 = vpop.f32.mrb[10].mxu1 }
 0x44b   : > { %1402 = vst [vmem:[%s448_s19 + $0x8] sm:$0xff] %v1914_v8  ;;  %v1392_v9 = vpop.f32.mrb[11].mxu1 }
 0x44c   : > { %1401 = vst [vmem:[%s448_s19] sm:$0xff] %v1392_v9 }
 0x44d   : > { %2282 = shalt.err (!%p2279_p6)
}
 0x44e   : > { %s2283_s21 = scalar_lea.hbm %s2723_s13, 256  ;;  %s2287_s30 = scalar_lea.hbm %s2781_s10, 512 }
 0x44f   : > { %p2284_p7 = scmp.ne.s32.totalorder %s2723_s13, %s2283_s21  ;;  %p2288_p4 = scmp.lt.u32.totalorder %s2723_s13, %s2781_s10 }
 0x450   : > { %p2289_p1 = scmp.lt.u32.totalorder %s2287_s30, %s2283_s21  ;;  %p2291_p13 = scmp.lt.u32.totalorder %s2283_s21, %s2723_s13 }
 0x451   : > { %p2285_p9 = pnand %p2284_p7, %p2810_p10 }
 0x452   : > { %p2290_p8 = por %p2289_p1, %p2288_p4 }
 0x453   : > { %p2286_p12 = pneg %p2285_p9 }
 0x454   : > { %p2292_p11 = por %p2291_p13, %p2290_p8 }
 0x456   : > { %p2293_p0 = pnand %p2292_p11, %p2286_p12 }
 0x458   : > { %2296 = shalt.err (!%p2293_p0)
}
 0x459   : > { %s2363_s24 = smov 128   ;;  %s2364_s28 = smov 8  }
 0x45a   : > { %2107 = dma.vmem_to_hbm [thread:$0]  (%p2810_p10), %s2718_s12, 256, %s2723_s13, %s2725_s11, %s2363_s24, %s2363_s24, %s2364_s28  }
 0x45b PF: > { %s2811_s19 = sld [smem:[#allocation15_spill]]  ;;  %s2812_s15 = sld [smem:[#allocation12_spill]] }
 0x45c   : > { %s2813_s20 = sld [smem:[#allocation17_spill]] }
 0x461   : > { %p2129_p2 = scmp.ge.s32.totalorder %s2811_s19, 2  ;;  %s1434_s6 = sand.u32 1, %s2812_s15  }
 0x462   : > { %p2814_p3 = scmp.ne.s32.totalorder %s2813_s20, 0  ;;  %s1435_s29 = scalar_lea.sflag [#allocation4], %s1434_s6 }
 0x464   : > { %p2120_p5 = pnand %p2129_p2, %p2814_p3 }
 0x466   : > { %2330 = dma.done.wait (!%p2120_p5), %s1435_s29, 256  }
 0x467   : > { %2332 = vsyncadd (!%p2120_p5), %s1435_s29, 4294967040  ;;  %s25_s18 = sadd.s32 1, %s2811_s19   ;;  %s2815_s16 = sld [smem:[#allocation13_spill]] }
 0x468   : > { %p22_p6 = scmp.ge.s32.totalorder %s25_s18, 4   ;;  %s2816_s15 = sld [smem:[#allocation18_spill]] }
 0x469   : > { %s2817_s17 = sld [smem:[#allocation14_spill]]  ;;  %s2818_s23 = sld [smem:[#allocation16_spill]] }
 0x46a   : > { %s2819_s13 = smov %s2339_s14  ;;  %24 = sbr.rel (!%p22_p6) target bundleno = 8 (0x8), region = 114 }
 0x46d   : > { %s2820_s14 = smov %s2815_s16 }
 0x46f   : > { %s2821_s16 = smov %s2817_s17  ;;  %s2822_s17 = smov %s2818_s23 }
 0x471   :  { %1440 = vsyncpa [#allocation3], 1 }
 0x472   :  { %1442 = vsyncpa [#allocation3 + $0x1], 1 }
 0x473   :  { %1443 = vsyncpa [#allocation6], 1 }
 0x474   :  { %1444 = vsyncpa [#allocation4], 1 }
 0x475   :  { %1446 = vsyncpa [#allocation4 + $0x1], 1 }

</bundles_post_ra>
